<compile_context>
chip_gen: v5e
topology: v5e:2x2
jax: 0.10.0
libtpu: 0.0.40
codegen_flags: <defaults>
</compile_context>

<pallas_src>
import jax
import jax.numpy as jnp
from jax import lax
from jax.experimental import pallas as pl
from jax.experimental.pallas import tpu as pltpu
import numpy as np

LANE = 128
SUBLANE = 8


# ----------------------------------------------------------------------------
# Small helpers (host-side, run once at parameter-prep time)
# ----------------------------------------------------------------------------
def _round_up(n, m):
    return ((n + m - 1) // m) * m


def _pad_axis(x, target, axis):
    size = x.shape[axis]
    if size == target:
        return x
    widths = [(0, 0)] * x.ndim
    widths[axis] = (0, target - size)
    return jnp.pad(x, widths)


def _pad_gates(w, nhid, nhid_p):
    """Pad the PyTorch-packed (4*nhid, ...) gate axis to (4*nhid_p, ...),
    keeping the i|f|g|o block structure (each gate block padded separately)."""
    if nhid_p == nhid:
        return w
    chunks = [w[k * nhid:(k + 1) * nhid] for k in range(4)]
    widths = [(0, nhid_p - nhid)] + [(0, 0)] * (w.ndim - 1)
    return jnp.concatenate([jnp.pad(c, widths) for c in chunks], axis=0)


def _pick_tile(dim, cap, bases):
    """Largest multiple of a base in `bases` (tried in order) that divides `dim`
    and is <= cap; falls back to the full dim."""
    for base in bases:
        t = min(cap, dim)
        t = (t // base) * base
        while t >= base:
            if dim % t == 0:
                return t
            t -= base
    return dim


# ----------------------------------------------------------------------------
# Generic tiled matmul + bias kernel (used for gates_x precompute and decoder)
#   x: (N, K) bf16, w: (K, M) bf16, b: (1, M) f32 -> (N, M) out_dtype
# ----------------------------------------------------------------------------
def _matmul_bias_kernel(x_ref, w_ref, b_ref, o_ref, acc_ref):
    k = pl.program_id(2)

    @pl.when(k == 0)
    def _():
        acc_ref[...] = jnp.zeros_like(acc_ref)

    acc_ref[...] += jnp.dot(x_ref[...], w_ref[...],
                            preferred_element_type=jnp.float32)

    @pl.when(k == pl.num_programs(2) - 1)
    def _():
        o_ref[...] = (acc_ref[...] + b_ref[...]).astype(o_ref.dtype)


def matmul_bias(x, w, b, *, out_dtype=jnp.float32,
                tm_cap=256, tn_cap=512, tk_cap=512):
    N, K = x.shape
    K2, M = w.shape
    assert K == K2 and b.shape == (1, M)
    # bf16 operands: align sublane tiles to the native bf16 (16, 128) tile.
    tm = _pick_tile(N, tm_cap, (16, SUBLANE))
    tn = _pick_tile(M, tn_cap, (LANE,))
    tk = _pick_tile(K, tk_cap, (LANE,))
    grid = (N // tm, M // tn, K // tk)

    out_bytes = jnp.dtype(out_dtype).itemsize
    vmem_bytes = (
        2 * tm * tk * 2          # x blocks, double-buffered bf16
        + 2 * tk * tn * 2        # w blocks, double-buffered bf16
        + 2 * tn * 4             # bias blocks
        + 2 * tm * tn * out_bytes  # output blocks
        + tm * tn * 4            # f32 accumulator scratch
    )
    vmem_limit = min(int(vmem_bytes) + (8 << 20), 64 << 20)

    return pl.pallas_call(
        _matmul_bias_kernel,
        out_shape=jax.ShapeDtypeStruct((N, M), out_dtype),
        grid_spec=pltpu.PrefetchScalarGridSpec(
            num_scalar_prefetch=0,
            grid=grid,
            in_specs=[
                pl.BlockSpec((tm, tk), lambda i, j, k: (i, k)),
                pl.BlockSpec((tk, tn), lambda i, j, k: (k, j)),
                pl.BlockSpec((1, tn), lambda i, j, k: (0, j)),
            ],
            out_specs=pl.BlockSpec((tm, tn), lambda i, j, k: (i, j)),
            scratch_shapes=[pltpu.VMEM((tm, tn), jnp.float32)],
        ),
        compiler_params=pltpu.CompilerParams(
            dimension_semantics=("parallel", "parallel", "arbitrary"),
            vmem_limit_bytes=vmem_limit,
        ),
    )(x, w, b)


# ----------------------------------------------------------------------------
# LSTM recurrence kernel.  Input projection is precomputed (bf16); each grid
# step handles t_blk timesteps for one batch block; the f32 h/c carry lives in
# the hT/cT output refs (constant time index -> resident across the grid).
# ----------------------------------------------------------------------------
def _lstm_recurrence_kernel(gx_ref, whh_ref, y_ref, hT_ref, cT_ref):
    t = pl.program_id(1)

    @pl.when(t == 0)
    def _():
        hT_ref[...] = jnp.zeros_like(hT_ref)
        cT_ref[...] = jnp.zeros_like(cT_ref)

    H = hT_ref.shape[1]
    t_blk = gx_ref.shape[0]

    def step(tt, carry):
        h, c = carry
        gates = gx_ref[tt].astype(jnp.float32) + jnp.dot(
            h.astype(jnp.bfloat16), whh_ref[...],
            preferred_element_type=jnp.float32)          # (Bb, 4H) f32
        i = jax.nn.sigmoid(gates[:, 0 * H:1 * H])
        f = jax.nn.sigmoid(gates[:, 1 * H:2 * H])
        g = jnp.tanh(gates[:, 2 * H:3 * H])
        o = jax.nn.sigmoid(gates[:, 3 * H:4 * H])
        c_new = f * c + i * g
        h_new = o * jnp.tanh(c_new)
        y_ref[tt] = h_new.astype(y_ref.dtype)
        return h_new, c_new

    h_fin, c_fin = lax.fori_loop(
        0, t_blk, step, (hT_ref[...], cT_ref[...]), unroll=True)
    hT_ref[...] = h_fin
    cT_ref[...] = c_fin


def lstm_recurrence(gates_x, whh_t, *, t_block=16):
    """gates_x: (T, B, 4H) bf16 (already = x @ W_ih^T + b_ih + b_hh).
    whh_t: (H, 4H) bf16.  Returns (y (T,B,H) bf16, h_T (B,H) f32, c_T (B,H) f32)."""
    T, B, G = gates_x.shape
    H = whh_t.shape[0]
    assert G == 4 * H

    t_blk = 1
    for cand in (t_block, 16, 8, 4, 2, 1):
        if cand >= 1 and T % cand == 0:
            t_blk = cand
            break

    # Split batch across TensorCores (v7x megacore) only when each block stays
    # sublane-aligned; otherwise keep a single batch block.
    nb = 2 if (B % 2 == 0 and (B // 2) % SUBLANE == 0) else 1
    b_blk = B // nb

    grid = (nb, T // t_blk)

    vmem_bytes = (
        H * G * 2                     # W_hh, single-buffered bf16
        + 2 * t_blk * b_blk * G * 2   # gx blocks, double-buffered bf16
        + 2 * t_blk * b_blk * H * 2   # y blocks, double-buffered bf16
        + 2 * 2 * b_blk * H * 4       # hT/cT f32 output blocks
    )
    vmem_limit = min(int(vmem_bytes) + (8 << 20), 64 << 20)

    out_shapes = (
        jax.ShapeDtypeStruct((T, B, H), jnp.bfloat16),
        jax.ShapeDtypeStruct((B, H), jnp.float32),
        jax.ShapeDtypeStruct((B, H), jnp.float32),
    )
    grid_spec = pltpu.PrefetchScalarGridSpec(
        num_scalar_prefetch=0,
        grid=grid,
        in_specs=[
            pl.BlockSpec((t_blk, b_blk, G), lambda b, t: (t, b, 0)),
            # Loop-invariant weight: constant index_map + single buffer.
            pl.BlockSpec((H, G), lambda b, t: (0, 0),
                         pipeline_mode=pl.Buffered(1)),
        ],
        out_specs=[
            pl.BlockSpec((t_blk, b_blk, H), lambda b, t: (t, b, 0)),
            pl.BlockSpec((b_blk, H), lambda b, t: (b, 0)),
            pl.BlockSpec((b_blk, H), lambda b, t: (b, 0)),
        ],
    )
    return pl.pallas_call(
        _lstm_recurrence_kernel,
        out_shape=out_shapes,
        grid_spec=grid_spec,
        compiler_params=pltpu.CompilerParams(
            # batch blocks independent (parallel); time carries state (arbitrary)
            dimension_semantics=("parallel", "arbitrary"),
            vmem_limit_bytes=vmem_limit,
        ),
    )(gates_x, whh_t)


# ----------------------------------------------------------------------------
# Parameters: raw PyTorch-layout f32 params, plus one-time prep (pad/transpose/cast)
# ----------------------------------------------------------------------------
def make_params(key, nvoc, ninput, nhid, nlayers):
    keys = jax.random.split(key, 2 + 4 * nlayers)
    init_u = 0.1
    params = {
        "embedding": jax.random.uniform(keys[0], (nvoc, ninput), jnp.float32,
                                        -init_u, init_u),
        "dec_w": jax.random.uniform(keys[1], (nvoc, nhid), jnp.float32,
                                    -init_u, init_u),
        "dec_b": jnp.zeros((nvoc,), jnp.float32),
        "lstm": [],
    }
    stdv = 1.0 / np.sqrt(nhid)
    for l in range(nlayers):
        n_in = ninput if l == 0 else nhid
        k = keys[2 + 4 * l: 2 + 4 * (l + 1)]
        params["lstm"].append({
            "w_ih": jax.random.uniform(k[0], (4 * nhid, n_in), jnp.float32,
                                       -stdv, stdv),
            "w_hh": jax.random.uniform(k[1], (4 * nhid, nhid), jnp.float32,
                                       -stdv, stdv),
            "b_ih": jax.random.uniform(k[2], (4 * nhid,), jnp.float32,
                                       -stdv, stdv),
            "b_hh": jax.random.uniform(k[3], (4 * nhid,), jnp.float32,
                                       -stdv, stdv),
        })
    return params


def prepare_params(params):
    """Pad lane dims to multiples of 128, fuse biases, pre-transpose and pre-cast
    MXU weights to bf16.  Done once, outside the forward pass."""
    nvoc, ninput = params["embedding"].shape
    nhid = params["lstm"][0]["w_hh"].shape[1]
    ninput_p = _round_up(ninput, LANE)
    nhid_p = _round_up(nhid, LANE)
    nvoc_p = _round_up(nvoc, LANE)

    dec_w = _pad_axis(_pad_axis(params["dec_w"], nvoc_p, 0), nhid_p, 1)
    prep = {
        "nvoc": nvoc,
        "nhid": nhid,
        "embedding": _pad_axis(params["embedding"], ninput_p, 1).astype(jnp.bfloat16),
        "dec_wt": jnp.transpose(dec_w).astype(jnp.bfloat16),          # (nhid_p, nvoc_p)
        "dec_b": _pad_axis(params["dec_b"], nvoc_p, 0).reshape(1, nvoc_p),
        "lstm": [],
    }
    for lp in params["lstm"]:
        n_in = lp["w_ih"].shape[1]
        n_in_p = _round_up(n_in, LANE)
        wih = _pad_axis(_pad_gates(lp["w_ih"], nhid, nhid_p), n_in_p, 1)
        whh = _pad_axis(_pad_gates(lp["w_hh"], nhid, nhid_p), nhid_p, 1)
        bias = _pad_gates(lp["b_ih"] + lp["b_hh"], nhid, nhid_p)
        prep["lstm"].append({
            "wih_t": jnp.transpose(wih).astype(jnp.bfloat16),         # (n_in_p, 4*nhid_p)
            "whh_t": jnp.transpose(whh).astype(jnp.bfloat16),         # (nhid_p, 4*nhid_p)
            "bias": bias.reshape(1, 4 * nhid_p).astype(jnp.float32),
        })
    return prep


# ----------------------------------------------------------------------------
# Full model forward
# ----------------------------------------------------------------------------
def lm_model_forward(prep, tokens):
    """tokens: int32 (T, B).  Returns (decoded (T, B, nvoc), (h_n, c_n))."""
    T, B = tokens.shape
    nvoc, nhid = prep["nvoc"], prep["nhid"]

    # Embedding lookup (glue; gather stays in plain JAX), bf16 padded table.
    x = jnp.take(prep["embedding"], tokens, axis=0)          # (T, B, ninput_p) bf16
    # Dropout(0.5) in eval mode -> identity.

    h_fs, c_fs = [], []
    for lp in prep["lstm"]:
        n_in = x.shape[2]
        # Hoisted input projection: one big tiled MXU matmul over all T*B tokens.
        # gates_x stored in bf16 (halves HBM traffic + recurrence VMEM blocks).
        gx = matmul_bias(x.reshape(T * B, n_in), lp["wih_t"], lp["bias"],
                         out_dtype=jnp.bfloat16)
        G = lp["wih_t"].shape[1]
        y, h_T, c_T = lstm_recurrence(gx.reshape(T, B, G), lp["whh_t"])
        h_fs.append(h_T[:, :nhid])
        c_fs.append(c_T[:, :nhid])
        x = y                                                # (T, B, nhid_p) bf16

    # Decoder: larger tiles to cut re-streaming of the vocab-sized weight.
    dec = matmul_bias(x.reshape(T * B, x.shape[2]), prep["dec_wt"], prep["dec_b"],
                      out_dtype=jnp.float32,
                      tm_cap=512, tn_cap=512, tk_cap=1024)
    # TODO(synk): slice vocab padding inside the kernel epilogue / emit bf16 logits
    # if the downstream loss tolerates it (halves decoder writeback traffic).
    decoded = dec.reshape(T, B, -1)[:, :, :nvoc]
    h_n = jnp.stack(h_fs, axis=0)                            # (nlayers, B, nhid)
    c_n = jnp.stack(c_fs, axis=0)
    return decoded, (h_n, c_n)


# ----------------------------------------------------------------------------
# Pure-JAX f32 reference (uses raw, un-padded params) for a correctness check
# ----------------------------------------------------------------------------
def lm_model_reference(params, tokens):
    T, B = tokens.shape
    x = jnp.take(params["embedding"], tokens, axis=0)
    h_fs, c_fs = [], []
    for lp in params["lstm"]:
        H = lp["w_hh"].shape[1]
        h = jnp.zeros((B, H), jnp.float32)
        c = jnp.zeros((B, H), jnp.float32)
        ys = []
        for t in range(T):
            g = (x[t] @ lp["w_ih"].T + h @ lp["w_hh"].T
                 + lp["b_ih"] + lp["b_hh"])
            i = jax.nn.sigmoid(g[:, 0 * H:1 * H])
            f = jax.nn.sigmoid(g[:, 1 * H:2 * H])
            gg = jnp.tanh(g[:, 2 * H:3 * H])
            o = jax.nn.sigmoid(g[:, 3 * H:4 * H])
            c = f * c + i * gg
            h = o * jnp.tanh(c)
            ys.append(h)
        x = jnp.stack(ys, axis=0)
        h_fs.append(h)
        c_fs.append(c)
    dec = x.reshape(T * B, -1) @ params["dec_w"].T + params["dec_b"]
    return dec.reshape(T, B, -1), (jnp.stack(h_fs, 0), jnp.stack(c_fs, 0))


if __name__ == "__main__":
    nvoc, ninput, nhid, nlayers = 40, 32, 32, 2
    T, B = 16, 8

    key = jax.random.PRNGKey(0)
    k_params, k_tok = jax.random.split(key)
    params = make_params(k_params, nvoc, ninput, nhid, nlayers)
    tokens = jax.random.randint(k_tok, (T, B), 0, nvoc, dtype=jnp.int32)

    prep = prepare_params(params)
    decoded, (h_n, c_n) = lm_model_forward(prep, tokens)
    jax.block_until_ready((decoded, h_n, c_n))

    ref_dec, (ref_h, ref_c) = lm_model_reference(params, tokens)
    # bf16 MXU operands / bf16 gates_x with f32 accumulation -> looser tolerance.
    np.testing.assert_allclose(np.asarray(decoded), np.asarray(ref_dec),
                               rtol=4e-2, atol=4e-2)
    np.testing.assert_allclose(np.asarray(h_n), np.asarray(ref_h),
                               rtol=4e-2, atol=4e-2)
    np.testing.assert_allclose(np.asarray(c_n), np.asarray(ref_c),
                               rtol=4e-2, atol=4e-2)

    assert decoded.shape == (T, B, nvoc)
    assert h_n.shape == (nlayers, B, nhid) and c_n.shape == (nlayers, B, nhid)
    print("KERNEL_OK")
</pallas_src>

<mosaic_0001>
module attributes {stable_mosaic.version = 11 : i64} {
  func.func @_matmul_bias_kernel(%arg0: i32, %arg1: i32, %arg2: i32, %arg3: memref<128x128xbf16, #tpu.memory_space<vmem>>, %arg4: memref<128x512xbf16, #tpu.memory_space<vmem>>, %arg5: memref<1x512xf32, #tpu.memory_space<vmem>>, %arg6: memref<128x512xbf16, #tpu.memory_space<vmem>>, %arg7: memref<128x512xf32, #tpu.memory_space<vmem>>) attributes {dimension_semantics = [#tpu.dimension_semantics<parallel>, #tpu.dimension_semantics<parallel>, #tpu.dimension_semantics<arbitrary>], iteration_bounds = array<i64: 1, 1, 1>, scalar_prefetch = 0 : i64, scratch_operands = 1 : i64, tpu.core_type = #tpu.core_type<tc>, window_params = [{transform_indices = @transform_0, window_bounds = array<i64: 128, 128>}, {transform_indices = @transform_1, window_bounds = array<i64: 128, 512>}, {transform_indices = @transform_2, window_bounds = array<i64: 1, 512>}, {transform_indices = @transform_3, window_bounds = array<i64: 128, 512>}]} {
    %c0_i32 = arith.constant 0 : i32
    %0 = arith.cmpi eq, %arg2, %c0_i32 : i32
    %1 = arith.extui %0 : i1 to i32
    %c0_i32_0 = arith.constant 0 : i32
    %2 = arith.cmpi ne, %1, %c0_i32_0 : i32
    scf.if %2 {
      %cst_10 = arith.constant 0.000000e+00 : f32
      %12 = vector.broadcast %cst_10 : f32 to vector<128x512xf32>
      %c0_11 = arith.constant 0 : index
      %c0_12 = arith.constant 0 : index
      %13 = vector.load %arg7[%c0_11, %c0_12] : memref<128x512xf32, #tpu.memory_space<vmem>>, vector<128x512xf32>
      tpu.vector_store %arg7[%c0_11, %c0_12], %12 {strides = array<i32>} : memref<128x512xf32, #tpu.memory_space<vmem>>, vector<128x512xf32>,
    } else {
    }
    %c0 = arith.constant 0 : index
    %c0_1 = arith.constant 0 : index
    %3 = vector.load %arg7[%c0, %c0_1] : memref<128x512xf32, #tpu.memory_space<vmem>>, vector<128x512xf32>
    %c0_2 = arith.constant 0 : index
    %c0_3 = arith.constant 0 : index
    %4 = vector.load %arg3[%c0_2, %c0_3] : memref<128x128xbf16, #tpu.memory_space<vmem>>, vector<128x128xbf16>
    %c0_4 = arith.constant 0 : index
    %c0_5 = arith.constant 0 : index
    %5 = vector.load %arg4[%c0_4, %c0_5] : memref<128x512xbf16, #tpu.memory_space<vmem>>, vector<128x512xbf16>
    %cst = arith.constant dense<0.000000e+00> : vector<128x512xf32>
    %6 = tpu.matmul %4, %5, %cst {dimension_numbers = #tpu.dot_dimension_numbers<[1], [0], [0], [1], [0, 0, 1, 1], [], []>} : vector<128x128xbf16>, vector<128x512xbf16>, vector<128x512xf32> -> vector<128x512xf32>
    %7 = arith.addf %3, %6 : vector<128x512xf32>
    %c0_6 = arith.constant 0 : index
    %c0_7 = arith.constant 0 : index
    %8 = vector.load %arg7[%c0_6, %c0_7] : memref<128x512xf32, #tpu.memory_space<vmem>>, vector<128x512xf32>
    tpu.vector_store %arg7[%c0_6, %c0_7], %7 {strides = array<i32>} : memref<128x512xf32, #tpu.memory_space<vmem>>, vector<128x512xf32>,
    %c0_i32_8 = arith.constant 0 : i32
    %9 = arith.cmpi eq, %arg2, %c0_i32_8 : i32
    %10 = arith.extui %9 : i1 to i32
    %c0_i32_9 = arith.constant 0 : i32
    %11 = arith.cmpi ne, %10, %c0_i32_9 : i32
    scf.if %11 {
      %c0_10 = arith.constant 0 : index
      %c0_11 = arith.constant 0 : index
      %12 = vector.load %arg7[%c0_10, %c0_11] : memref<128x512xf32, #tpu.memory_space<vmem>>, vector<128x512xf32>
      %c0_12 = arith.constant 0 : index
      %c0_13 = arith.constant 0 : index
      %13 = vector.load %arg5[%c0_12, %c0_13] : memref<1x512xf32, #tpu.memory_space<vmem>>, vector<1x512xf32>
      %14 = vector.broadcast %13 : vector<1x512xf32> to vector<128x512xf32>
      %15 = arith.addf %12, %14 : vector<128x512xf32>
      %16 = arith.truncf %15 : vector<128x512xf32> to vector<128x512xbf16>
      %c0_14 = arith.constant 0 : index
      %c0_15 = arith.constant 0 : index
      %17 = vector.load %arg6[%c0_14, %c0_15] : memref<128x512xbf16, #tpu.memory_space<vmem>>, vector<128x512xbf16>
      tpu.vector_store %arg6[%c0_14, %c0_15], %16 {strides = array<i32>} : memref<128x512xbf16, #tpu.memory_space<vmem>>, vector<128x512xbf16>,
    } else {
    }
    return
  }
  func.func @transform_0(%arg0: i32, %arg1: i32, %arg2: i32) -> (i32, i32) {
    %c0_i32 = arith.constant 0 : i32
    return %arg0, %arg2 : i32, i32
  }
  func.func @transform_1(%arg0: i32, %arg1: i32, %arg2: i32) -> (i32, i32) {
    %c0_i32 = arith.constant 0 : i32
    return %arg2, %arg1 : i32, i32
  }
  func.func @transform_2(%arg0: i32, %arg1: i32, %arg2: i32) -> (i32, i32) {
    %c0_i32 = arith.constant 0 : i32
    %c0_i32_0 = arith.constant 0 : i32
    return %c0_i32, %arg1 : i32, i32
  }
  func.func @transform_3(%arg0: i32, %arg1: i32, %arg2: i32) -> (i32, i32) {
    %c0_i32 = arith.constant 0 : i32
    return %arg0, %arg1 : i32, i32
  }
}

</mosaic_0001>

<bundles_post_ra>
// kernel: tpu_custom_call.1
= control target key start
LH: loop header
LB: loop body
LE: loop exit
PB: predicated region body
PF: predicated region fallthrough
CT: control target
= control target key end

     0   :  { %8 = vsyncpa [#allocation4], 0  ;;  %s1425_s0 = inlined_call_operand.hbm [shape: bf16[128,128], index: 0, kind: input, shape index: {}]   ;;  %s1426_s1 = inlined_call_operand.hbm [shape: bf16[128,512], index: 1, kind: input, shape index: {}]   ;;  %s1427_s2 = inlined_call_operand.hbm [shape: f32[1,512], index: 2, kind: input, shape index: {}]   ;;  %s1428_s3 = inlined_call_operand.hbm [shape: bf16[128,512], index: 3, kind: output, shape index: {}]  }
   0x1   :  { %9 = vsyncpa [#allocation7], 0  ;;  %s28_s14 = sshll.u32 %s1426_s1, 4  ;;  %s29_s14 = int_to_ptr.hbm [resolvable:$true] %s28_s14 }
   0x2   :  { %10 = vsyncpa [#allocation5], 0  ;;  %s1307_s15 = smov [#allocation6]   ;;  %s15_s19 = sshll.u32 %s1425_s0, 4  ;;  %s16_s19 = int_to_ptr.hbm [resolvable:$true] %s15_s19 }
   0x3   :  { %s30_s16 = sshll.u32 %s1307_s15, 4  ;;  %s1308_s20 = smov 256   ;;  %s31_s16 = int_to_ptr.vmem [resolvable:$true] %s30_s16 }
   0x4   :  { %s1309_s21 = smov 16   ;;  %s1310_s22 = smov [#allocation3]  }
   0x5   :  { %36 = dma.hbm_to_vmem [thread:$0]  %s29_s14, 4096, %s31_s16, [#allocation7], %s1308_s20, %s1308_s20, %s1309_s21  }
   0x6   :  { %s17_s23 = sshll.u32 %s1310_s22, 4  ;;  %s1311_s1 = smov 64   ;;  %s18_s23 = int_to_ptr.vmem [resolvable:$true] %s17_s23 }
   0x7   :  { %s1312_s24 = smov 4   ;;  %s42_s27 = sshll.u32 %s1427_s2, 4  ;;  %s43_s27 = int_to_ptr.hbm [resolvable:$true] %s42_s27 }
   0x8   :  { %23 = dma.hbm_to_vmem [thread:$0]  %s16_s19, 1024, %s18_s23, [#allocation4], %s1311_s1, %s1311_s1, %s1312_s24  }
   0x9   :  { %s1313_s28 = smov [#allocation8]  }
   0xa   :  { %s44_s0 = sshll.u32 %s1313_s28, 4  ;;  %s45_s0 = int_to_ptr.vmem [resolvable:$true] %s44_s0 }
   0xb   :  { %47 = dma.hbm_to_vmem [thread:$0]  %s43_s27, 64, %s45_s0, [#allocation7]  }
   0xc   :  { %1301 = dma.done.wait [#allocation4], 1024  }
   0xd   :  { %1302 = vsyncadd [#allocation4], 4294966272 }
   0xe   :  { %1303 = dma.done.wait [#allocation7], 4160  }
   0xf   :  { %1304 = vsyncadd [#allocation7], 4294963136  ;;  %v1143_v0 = vld [vmem:[#allocation6 + $0xe0] sm:$0xf]  ;;  %v1195_v1 = vld [vmem:[#allocation6 + $0xec] sm:$0xf0] }
  0x10   :  { %v1193_v2 = vld [vmem:[#allocation6 + $0xe4] sm:$0xf]  ;;  %v1144_v3 = vor.u32 %v1195_v1, %v1143_v0  ;;  %v1145_v4 = vld [vmem:[#allocation6 + $0xf0] sm:$0xf0]  ;;  %v1151_v5 = vld [vmem:[#allocation6 + $0xe8] sm:$0xf] }
  0x11   :  { %v1196_v6 = vld [vmem:[#allocation6 + $0xf4] sm:$0xf0]  ;;  %v1148_v7 = vor.u32 %v1193_v2, %v1145_v4  ;;  %v1194_v9 = vld [vmem:[#allocation6 + $0xec] sm:$0xf]  ;;  %v1153_v10 = vld [vmem:[#allocation6 + $0xf8] sm:$0xf0] }
  0x12   :  { %v1152_v8 = vor.u32 %v1196_v6, %v1151_v5  ;;  %v1127_v11 = vld [vmem:[#allocation6 + $0xc0] sm:$0xf]  ;;  %448 = vmatpush.bf16.msra.mxu0 %v1144_v3  ;;  %v1156_v12 = vor.u32 %v1194_v9, %v1153_v10  ;;  %v1191_v13 = vld [vmem:[#allocation6 + $0xcc] sm:$0xf0]  ;;  %v1189_v14 = vld [vmem:[#allocation6 + $0xc4] sm:$0xf] }
  0x13   :  { %v1129_v15 = vld [vmem:[#allocation6 + $0xd0] sm:$0xf0]  ;;  %497 = vmatpush.bf16.msra.mxu1 %v1148_v7  ;;  %v1128_v16 = vor.u32 %v1191_v13, %v1127_v11  ;;  %v1135_v18 = vld [vmem:[#allocation6 + $0xc8] sm:$0xf]  ;;  %v1192_v19 = vld [vmem:[#allocation6 + $0xd4] sm:$0xf0] }
  0x14   :  { %546 = vmatpush.bf16.msra.mxu2 %v1152_v8  ;;  %v1132_v17 = vor.u32 %v1189_v14, %v1129_v15  ;;  %v1190_v20 = vld [vmem:[#allocation6 + $0xcc] sm:$0xf]  ;;  %595 = vmatpush.bf16.msra.mxu3 %v1156_v12  ;;  %v1136_v21 = vor.u32 %v1192_v19, %v1135_v18  ;;  %v1137_v22 = vld [vmem:[#allocation6 + $0xd8] sm:$0xf0]  ;;  %v1111_v23 = vld [vmem:[#allocation6 + $0xa0] sm:$0xf] }
  0x15   :  { %v1187_v24 = vld [vmem:[#allocation6 + $0xac] sm:$0xf0]  ;;  %v1140_v25 = vor.u32 %v1190_v20, %v1137_v22  ;;  %v1185_v26 = vld [vmem:[#allocation6 + $0xa4] sm:$0xf]  ;;  %v1113_v27 = vld [vmem:[#allocation6 + $0xb0] sm:$0xf0] }
  0x16   :  { %v1119_v28 = vld [vmem:[#allocation6 + $0xa8] sm:$0xf]  ;;  %449 = vmatpush.bf16.msra.mxu0 %v1128_v16  ;;  %v1112_v29 = vor.u32 %v1187_v24, %v1111_v23  ;;  %v1188_v30 = vld [vmem:[#allocation6 + $0xb4] sm:$0xf0]  ;;  %v1186_v31 = vld [vmem:[#allocation6 + $0xac] sm:$0xf]  ;;  %v1116_v33 = vor.u32 %v1185_v26, %v1113_v27 }
  0x17   :  { %v1121_v32 = vld [vmem:[#allocation6 + $0xb8] sm:$0xf0]  ;;  %498 = vmatpush.bf16.msra.mxu1 %v1132_v17  ;;  %v1120_v34 = vor.u32 %v1188_v30, %v1119_v28  ;;  %v1095_v35 = vld [vmem:[#allocation6 + $0x80] sm:$0xf]  ;;  %v1183_v36 = vld [vmem:[#allocation6 + $0x8c] sm:$0xf0] }
  0x18   :  { %547 = vmatpush.bf16.msra.mxu2 %v1136_v21  ;;  %v1181_v37 = vld [vmem:[#allocation6 + $0x84] sm:$0xf]  ;;  %596 = vmatpush.bf16.msra.mxu3 %v1140_v25  ;;  %v1124_v38 = vor.u32 %v1186_v31, %v1121_v32  ;;  %v1097_v39 = vld [vmem:[#allocation6 + $0x90] sm:$0xf0]  ;;  %v1103_v40 = vld [vmem:[#allocation6 + $0x88] sm:$0xf]  ;;  %v1096_v44 = vor.u32 %v1183_v36, %v1095_v35 }
  0x19   :  { %v1184_v41 = vld [vmem:[#allocation6 + $0x94] sm:$0xf0]  ;;  %v1182_v42 = vld [vmem:[#allocation6 + $0x8c] sm:$0xf]  ;;  %v1105_v43 = vld [vmem:[#allocation6 + $0x98] sm:$0xf0]  ;;  %v1100_v45 = vor.u32 %v1181_v37, %v1097_v39 }
  0x1a   :  { %450 = vmatpush.bf16.msra.mxu0 %v1112_v29  ;;  %v1104_v46 = vor.u32 %v1184_v41, %v1103_v40  ;;  %v1079_v47 = vld [vmem:[#allocation6 + $0x60] sm:$0xf]  ;;  %v1179_v48 = vld [vmem:[#allocation6 + $0x6c] sm:$0xf0]  ;;  %v1177_v49 = vld [vmem:[#allocation6 + $0x64] sm:$0xf]  ;;  %v1108_v50 = vor.u32 %v1182_v42, %v1105_v43 }
  0x1b   :  { %499 = vmatpush.bf16.msra.mxu1 %v1116_v33  ;;  %v1081_v51 = vld [vmem:[#allocation6 + $0x70] sm:$0xf0]  ;;  %v1087_v52 = vld [vmem:[#allocation6 + $0x68] sm:$0xf]  ;;  %v1180_v53 = vld [vmem:[#allocation6 + $0x74] sm:$0xf0]  ;;  %v1080_v56 = vor.u32 %v1179_v48, %v1079_v47 }
  0x1c   :  { %548 = vmatpush.bf16.msra.mxu2 %v1120_v34  ;;  %597 = vmatpush.bf16.msra.mxu3 %v1124_v38  ;;  %v1178_v54 = vld [vmem:[#allocation6 + $0x6c] sm:$0xf]  ;;  %v1089_v55 = vld [vmem:[#allocation6 + $0x78] sm:$0xf0]  ;;  %v1084_v57 = vor.u32 %v1177_v49, %v1081_v51  ;;  %v1088_v58 = vor.u32 %v1180_v53, %v1087_v52  ;;  %v1063_v59 = vld [vmem:[#allocation6 + $0x40] sm:$0xf] }
  0x1d   :  { %v1175_v60 = vld [vmem:[#allocation6 + $0x4c] sm:$0xf0]  ;;  %v1173_v61 = vld [vmem:[#allocation6 + $0x44] sm:$0xf]  ;;  %v1092_v62 = vor.u32 %v1178_v54, %v1089_v55  ;;  %v1065_v63 = vld [vmem:[#allocation6 + $0x50] sm:$0xf0] }
  0x1e   :  { %451 = vmatpush.bf16.msra.mxu0 %v1096_v44  ;;  %v1071_v0 = vld [vmem:[#allocation6 + $0x48] sm:$0xf]  ;;  %v1176_v1 = vld [vmem:[#allocation6 + $0x54] sm:$0xf0]  ;;  %v1174_v2 = vld [vmem:[#allocation6 + $0x4c] sm:$0xf]  ;;  %v1064_v4 = vor.u32 %v1175_v60, %v1063_v59  ;;  %v1068_v5 = vor.u32 %v1173_v61, %v1065_v63 }
  0x1f   :  { %500 = vmatpush.bf16.msra.mxu1 %v1100_v45  ;;  %v1073_v3 = vld [vmem:[#allocation6 + $0x58] sm:$0xf0]  ;;  %v1072_v6 = vor.u32 %v1176_v1, %v1071_v0  ;;  %v1047_v7 = vld [vmem:[#allocation6 + $0x20] sm:$0xf]  ;;  %v1171_v8 = vld [vmem:[#allocation6 + $0x2c] sm:$0xf0] }
  0x20   :  { %549 = vmatpush.bf16.msra.mxu2 %v1104_v46  ;;  %598 = vmatpush.bf16.msra.mxu3 %v1108_v50  ;;  %v1169_v9 = vld [vmem:[#allocation6 + $0x24] sm:$0xf]  ;;  %v1076_v10 = vor.u32 %v1174_v2, %v1073_v3  ;;  %v1049_v11 = vld [vmem:[#allocation6 + $0x30] sm:$0xf0]  ;;  %v1055_v12 = vld [vmem:[#allocation6 + $0x28] sm:$0xf]  ;;  %v1048_v16 = vor.u32 %v1171_v8, %v1047_v7 }
  0x21   :  { %v1172_v13 = vld [vmem:[#allocation6 + $0x34] sm:$0xf0]  ;;  %v1170_v14 = vld [vmem:[#allocation6 + $0x2c] sm:$0xf]  ;;  %v1057_v15 = vld [vmem:[#allocation6 + $0x38] sm:$0xf0]  ;;  %v1052_v17 = vor.u32 %v1169_v9, %v1049_v11 }
  0x22   :  { %452 = vmatpush.bf16.msra.mxu0 %v1080_v56  ;;  %v1056_v18 = vor.u32 %v1172_v13, %v1055_v12  ;;  %v1031_v19 = vld [vmem:[#allocation6] sm:$0xf]  ;;  %v1167_v20 = vld [vmem:[#allocation6 + $0xc] sm:$0xf0]  ;;  %v1165_v21 = vld [vmem:[#allocation6 + $0x4] sm:$0xf]  ;;  %v1060_v22 = vor.u32 %v1170_v14, %v1057_v15 }
  0x23   :  { %501 = vmatpush.bf16.msra.mxu1 %v1084_v57  ;;  %v1033_v23 = vld [vmem:[#allocation6 + $0x10] sm:$0xf0]  ;;  %v1039_v24 = vld [vmem:[#allocation6 + $0x8] sm:$0xf]  ;;  %v1168_v25 = vld [vmem:[#allocation6 + $0x14] sm:$0xf0]  ;;  %v1032_v28 = vor.u32 %v1167_v20, %v1031_v19 }
  0x24   :  { %550 = vmatpush.bf16.msra.mxu2 %v1088_v58  ;;  %599 = vmatpush.bf16.msra.mxu3 %v1092_v62  ;;  %v1166_v26 = vld [vmem:[#allocation6 + $0xc] sm:$0xf]  ;;  %v1041_v27 = vld [vmem:[#allocation6 + $0x18] sm:$0xf0]  ;;  %v1036_v29 = vor.u32 %v1165_v21, %v1033_v23  ;;  %v1040_v30 = vor.u32 %v1168_v25, %v1039_v24  ;;  %v1157_v32 = vld [vmem:[#allocation3] sm:$0xff]  ;;  %s1314_s2 = smov [#allocation9]  }
  0x25   :  { %v1044_v31 = vor.u32 %v1166_v26, %v1041_v27  ;;  %v1158_v33 = vld [vmem:[#allocation3 + $0x8] sm:$0xff]  ;;  %v1159_v34 = vld [vmem:[#allocation3 + $0x10] sm:$0xff]  ;;  %v1160_v35 = vld [vmem:[#allocation3 + $0x18] sm:$0xff]  ;;  %s981_s29 = sshll.u32 %s1314_s2, 4  ;;  %s983_s5 = sshll.u32 %s1428_s3, 4  ;;  %s982_s29 = int_to_ptr.vmem [resolvable:$true] %s981_s29  ;;  %s984_s5 = int_to_ptr.hbm [resolvable:$true] %s983_s5 }
  0x26   :  { %453 = vmatpush.bf16.msra.mxu0 %v1064_v4  ;;  %v1161_v36 = vld [vmem:[#allocation3 + $0x20] sm:$0xff]  ;;  %v1162_v37 = vld [vmem:[#allocation3 + $0x28] sm:$0xff]  ;;  %v1163_v38 = vld [vmem:[#allocation3 + $0x30] sm:$0xff] }
  0x27   :  { %502 = vmatpush.bf16.msra.mxu1 %v1068_v5  ;;  %v1164_v39 = vld [vmem:[#allocation3 + $0x38] sm:$0xff]  ;;  %v839_v40 = vld [vmem:[#allocation8] sm:$0xf] }
  0x28   :  { %551 = vmatpush.bf16.msra.mxu2 %v1072_v6  ;;  %600 = vmatpush.bf16.msra.mxu3 %v1076_v10  ;;  %v1347_v41 = vperm.slane %v839_v40, 0  ;;  %v1349_v42 = vperm.slane %v839_v40, 1  ;;  %v1353_v48 = vperm.slane %v839_v40, 2  ;;  %v1355_v49 = vperm.slane %v839_v40, 3 }
  0x2a   :  { %454 = vmatpush.bf16.msra.mxu0 %v1048_v16 }
  0x2b   :  { %503 = vmatpush.bf16.msra.mxu1 %v1052_v17 }
  0x2c   :  { %552 = vmatpush.bf16.msra.mxu2 %v1056_v18  ;;  %601 = vmatpush.bf16.msra.mxu3 %v1060_v22 }
  0x2e   :  { %455 = vmatpush.bf16.msra.mxu0 %v1032_v28 }
  0x2f   :  { %504 = vmatpush.bf16.msra.mxu1 %v1036_v29 }
  0x30   :  { %553 = vmatpush.bf16.msra.mxu2 %v1040_v30  ;;  %602 = vmatpush.bf16.msra.mxu3 %v1044_v31 }
  0x31   :  { %456 = vmatmul.bf16.vlgmr.msra.gmra.mxu0 %v1157_v32 }
  0x32   :  { %505 = vmatmul.bf16.vlgmr.msra.gmra.mxu1 %v1157_v32 }
  0x33   :  { %554 = vmatmul.bf16.vlgmr.msra.gmra.mxu2 %v1157_v32  ;;  %603 = vmatmul.bf16.vlgmr.msra.gmra.mxu3 %v1157_v32 }
  0x41   :  { %461 = vmatmul.bf16.gmra.mxu0 %v1158_v33 }
  0x42   :  { %510 = vmatmul.bf16.gmra.mxu1 %v1158_v33 }
  0x43   :  { %559 = vmatmul.bf16.gmra.mxu2 %v1158_v33  ;;  %608 = vmatmul.bf16.gmra.mxu3 %v1158_v33 }
  0x51   :  { %466 = vmatmul.bf16.gmra.mxu0 %v1159_v34 }
  0x52   :  { %515 = vmatmul.bf16.gmra.mxu1 %v1159_v34 }
  0x53   :  { %564 = vmatmul.bf16.gmra.mxu2 %v1159_v34  ;;  %613 = vmatmul.bf16.gmra.mxu3 %v1159_v34 }
  0x61   :  { %471 = vmatmul.bf16.gmra.mxu0 %v1160_v35 }
  0x62   :  { %520 = vmatmul.bf16.gmra.mxu1 %v1160_v35 }
  0x63   :  { %569 = vmatmul.bf16.gmra.mxu2 %v1160_v35  ;;  %618 = vmatmul.bf16.gmra.mxu3 %v1160_v35 }
  0x71   :  { %476 = vmatmul.bf16.gmra.mxu0 %v1161_v36 }
  0x72   :  { %525 = vmatmul.bf16.gmra.mxu1 %v1161_v36 }
  0x73   :  { %574 = vmatmul.bf16.gmra.mxu2 %v1161_v36  ;;  %623 = vmatmul.bf16.gmra.mxu3 %v1161_v36 }
  0x81   :  { %481 = vmatmul.bf16.gmra.mxu0 %v1162_v37 }
  0x82   :  { %530 = vmatmul.bf16.gmra.mxu1 %v1162_v37 }
  0x83   :  { %579 = vmatmul.bf16.gmra.mxu2 %v1162_v37  ;;  %628 = vmatmul.bf16.gmra.mxu3 %v1162_v37 }
  0x91   :  { %486 = vmatmul.bf16.gmra.mxu0 %v1163_v38 }
  0x92   :  { %535 = vmatmul.bf16.gmra.mxu1 %v1163_v38 }
  0x93   :  { %584 = vmatmul.bf16.gmra.mxu2 %v1163_v38  ;;  %633 = vmatmul.bf16.gmra.mxu3 %v1163_v38 }
  0xa1   :  { %491 = vmatmul.bf16.gmra.mxu0 %v1164_v39 }
  0xa2   :  { %540 = vmatmul.bf16.gmra.mxu1 %v1164_v39 }
  0xa3   :  { %589 = vmatmul.bf16.gmra.mxu2 %v1164_v39  ;;  %638 = vmatmul.bf16.gmra.mxu3 %v1164_v39 }
  0xae   :  { %v457_v43 = vpop.f32.mrf.mxu0 }
  0xaf   :  { %v849_v44 = vadd.f32 %v1347_v41, %v457_v43  ;;  %v506_v45 = vpop.f32.mrf.mxu1 }
  0xb0   :  { %v850_v46 = vadd.f32 %v1349_v42, %v506_v45 }
  0xb2   :  { %v913_v47 = vpack.c.bf16 %v850_v46, %v849_v44 }
  0xb4   :  { %945 = vst [vmem:[#allocation9] sm:$0xff] %v913_v47 }
  0xb6   :  { %v555_v50 = vpop.f32.mrf.mxu2  ;;  %v604_v52 = vpop.f32.mrf.mxu3 }
  0xb7   :  { %v851_v51 = vadd.f32 %v1353_v48, %v555_v50  ;;  %v459_v53 = vpop.f32.mrf.mxu0  ;;  %v852_v54 = vadd.f32 %v1355_v49, %v604_v52  ;;  %v508_v56 = vpop.f32.mrf.mxu1 }
  0xb8   :  { %v853_v55 = vadd.f32 %v1347_v41, %v459_v53  ;;  %v854_v57 = vadd.f32 %v1349_v42, %v508_v56 }
  0xb9   :  { %v914_v58 = vpack.c.bf16 %v852_v54, %v851_v51 }
  0xba   :  { %v915_v59 = vpack.c.bf16 %v854_v57, %v853_v55 }
  0xbb   :  { %946 = vst [vmem:[#allocation9 + $0x8] sm:$0xff] %v914_v58 }
  0xbc   :  { %947 = vst [vmem:[#allocation9 + $0x10] sm:$0xff] %v915_v59 }
  0xbe   :  { %v557_v60 = vpop.f32.mrf.mxu2  ;;  %v606_v62 = vpop.f32.mrf.mxu3 }
  0xbf   :  { %v855_v61 = vadd.f32 %v1353_v48, %v557_v60  ;;  %v462_v63 = vpop.f32.mrf.mxu0  ;;  %v856_v0 = vadd.f32 %v1355_v49, %v606_v62  ;;  %v511_v2 = vpop.f32.mrf.mxu1 }
  0xc0   :  { %v857_v1 = vadd.f32 %v1347_v41, %v462_v63  ;;  %v858_v3 = vadd.f32 %v1349_v42, %v511_v2 }
  0xc1   :  { %v916_v4 = vpack.c.bf16 %v856_v0, %v855_v61 }
  0xc2   :  { %v917_v5 = vpack.c.bf16 %v858_v3, %v857_v1 }
  0xc3   :  { %948 = vst [vmem:[#allocation9 + $0x18] sm:$0xff] %v916_v4 }
  0xc4   :  { %949 = vst [vmem:[#allocation9 + $0x20] sm:$0xff] %v917_v5 }
  0xc6   :  { %v560_v6 = vpop.f32.mrf.mxu2  ;;  %v609_v8 = vpop.f32.mrf.mxu3 }
  0xc7   :  { %v859_v7 = vadd.f32 %v1353_v48, %v560_v6  ;;  %v464_v9 = vpop.f32.mrf.mxu0  ;;  %v860_v10 = vadd.f32 %v1355_v49, %v609_v8  ;;  %v513_v12 = vpop.f32.mrf.mxu1 }
  0xc8   :  { %v861_v11 = vadd.f32 %v1347_v41, %v464_v9  ;;  %v862_v13 = vadd.f32 %v1349_v42, %v513_v12 }
  0xc9   :  { %v918_v14 = vpack.c.bf16 %v860_v10, %v859_v7 }
  0xca   :  { %v919_v15 = vpack.c.bf16 %v862_v13, %v861_v11 }
  0xcb   :  { %950 = vst [vmem:[#allocation9 + $0x28] sm:$0xff] %v918_v14 }
  0xcc   :  { %951 = vst [vmem:[#allocation9 + $0x30] sm:$0xff] %v919_v15 }
  0xce   :  { %v562_v16 = vpop.f32.mrf.mxu2  ;;  %v611_v18 = vpop.f32.mrf.mxu3 }
  0xcf   :  { %v863_v17 = vadd.f32 %v1353_v48, %v562_v16  ;;  %v467_v19 = vpop.f32.mrf.mxu0  ;;  %v864_v20 = vadd.f32 %v1355_v49, %v611_v18  ;;  %v516_v22 = vpop.f32.mrf.mxu1 }
  0xd0   :  { %v865_v21 = vadd.f32 %v1347_v41, %v467_v19  ;;  %v866_v23 = vadd.f32 %v1349_v42, %v516_v22 }
  0xd1   :  { %v920_v24 = vpack.c.bf16 %v864_v20, %v863_v17 }
  0xd2   :  { %v921_v25 = vpack.c.bf16 %v866_v23, %v865_v21 }
  0xd3   :  { %952 = vst [vmem:[#allocation9 + $0x38] sm:$0xff] %v920_v24 }
  0xd4   :  { %953 = vst [vmem:[#allocation9 + $0x40] sm:$0xff] %v921_v25 }
  0xd6   :  { %v565_v26 = vpop.f32.mrf.mxu2  ;;  %v614_v28 = vpop.f32.mrf.mxu3 }
  0xd7   :  { %v867_v27 = vadd.f32 %v1353_v48, %v565_v26  ;;  %v469_v29 = vpop.f32.mrf.mxu0  ;;  %v868_v30 = vadd.f32 %v1355_v49, %v614_v28  ;;  %v518_v32 = vpop.f32.mrf.mxu1 }
  0xd8   :  { %v869_v31 = vadd.f32 %v1347_v41, %v469_v29  ;;  %v870_v33 = vadd.f32 %v1349_v42, %v518_v32 }
  0xd9   :  { %v922_v34 = vpack.c.bf16 %v868_v30, %v867_v27 }
  0xda   :  { %v923_v35 = vpack.c.bf16 %v870_v33, %v869_v31 }
  0xdb   :  { %954 = vst [vmem:[#allocation9 + $0x48] sm:$0xff] %v922_v34 }
  0xdc   :  { %955 = vst [vmem:[#allocation9 + $0x50] sm:$0xff] %v923_v35 }
  0xde   :  { %v567_v36 = vpop.f32.mrf.mxu2  ;;  %v616_v38 = vpop.f32.mrf.mxu3 }
  0xdf   :  { %v871_v37 = vadd.f32 %v1353_v48, %v567_v36  ;;  %v472_v39 = vpop.f32.mrf.mxu0  ;;  %v872_v40 = vadd.f32 %v1355_v49, %v616_v38  ;;  %v521_v44 = vpop.f32.mrf.mxu1 }
  0xe0   :  { %v873_v43 = vadd.f32 %v1347_v41, %v472_v39  ;;  %v874_v45 = vadd.f32 %v1349_v42, %v521_v44 }
  0xe1   :  { %v924_v46 = vpack.c.bf16 %v872_v40, %v871_v37 }
  0xe2   :  { %v925_v47 = vpack.c.bf16 %v874_v45, %v873_v43 }
  0xe3   :  { %956 = vst [vmem:[#allocation9 + $0x58] sm:$0xff] %v924_v46 }
  0xe4   :  { %957 = vst [vmem:[#allocation9 + $0x60] sm:$0xff] %v925_v47 }
  0xe6   :  { %v570_v50 = vpop.f32.mrf.mxu2  ;;  %v619_v52 = vpop.f32.mrf.mxu3 }
  0xe7   :  { %v875_v51 = vadd.f32 %v1353_v48, %v570_v50  ;;  %v474_v53 = vpop.f32.mrf.mxu0  ;;  %v876_v54 = vadd.f32 %v1355_v49, %v619_v52  ;;  %v523_v56 = vpop.f32.mrf.mxu1 }
  0xe8   :  { %v877_v55 = vadd.f32 %v1347_v41, %v474_v53  ;;  %v878_v57 = vadd.f32 %v1349_v42, %v523_v56 }
  0xe9   :  { %v926_v58 = vpack.c.bf16 %v876_v54, %v875_v51 }
  0xea   :  { %v927_v59 = vpack.c.bf16 %v878_v57, %v877_v55 }
  0xeb   :  { %958 = vst [vmem:[#allocation9 + $0x68] sm:$0xff] %v926_v58 }
  0xec   :  { %959 = vst [vmem:[#allocation9 + $0x70] sm:$0xff] %v927_v59 }
  0xee   :  { %v572_v60 = vpop.f32.mrf.mxu2  ;;  %v621_v62 = vpop.f32.mrf.mxu3 }
  0xef   :  { %v879_v61 = vadd.f32 %v1353_v48, %v572_v60  ;;  %v477_v63 = vpop.f32.mrf.mxu0  ;;  %v880_v0 = vadd.f32 %v1355_v49, %v621_v62  ;;  %v526_v2 = vpop.f32.mrf.mxu1 }
  0xf0   :  { %v881_v1 = vadd.f32 %v1347_v41, %v477_v63  ;;  %v882_v3 = vadd.f32 %v1349_v42, %v526_v2 }
  0xf1   :  { %v928_v4 = vpack.c.bf16 %v880_v0, %v879_v61 }
  0xf2   :  { %v929_v5 = vpack.c.bf16 %v882_v3, %v881_v1 }
  0xf3   :  { %960 = vst [vmem:[#allocation9 + $0x78] sm:$0xff] %v928_v4 }
  0xf4   :  { %961 = vst [vmem:[#allocation9 + $0x80] sm:$0xff] %v929_v5 }
  0xf6   :  { %v575_v6 = vpop.f32.mrf.mxu2  ;;  %v624_v8 = vpop.f32.mrf.mxu3 }
  0xf7   :  { %v883_v7 = vadd.f32 %v1353_v48, %v575_v6  ;;  %v479_v9 = vpop.f32.mrf.mxu0  ;;  %v884_v10 = vadd.f32 %v1355_v49, %v624_v8  ;;  %v528_v12 = vpop.f32.mrf.mxu1 }
  0xf8   :  { %v885_v11 = vadd.f32 %v1347_v41, %v479_v9  ;;  %v886_v13 = vadd.f32 %v1349_v42, %v528_v12 }
  0xf9   :  { %v930_v14 = vpack.c.bf16 %v884_v10, %v883_v7 }
  0xfa   :  { %v931_v15 = vpack.c.bf16 %v886_v13, %v885_v11 }
  0xfb   :  { %962 = vst [vmem:[#allocation9 + $0x88] sm:$0xff] %v930_v14 }
  0xfc   :  { %963 = vst [vmem:[#allocation9 + $0x90] sm:$0xff] %v931_v15 }
  0xfe   :  { %v577_v16 = vpop.f32.mrf.mxu2  ;;  %v626_v18 = vpop.f32.mrf.mxu3 }
  0xff   :  { %v887_v17 = vadd.f32 %v1353_v48, %v577_v16  ;;  %v482_v19 = vpop.f32.mrf.mxu0  ;;  %v888_v20 = vadd.f32 %v1355_v49, %v626_v18  ;;  %v531_v22 = vpop.f32.mrf.mxu1 }
 0x100   :  { %v889_v21 = vadd.f32 %v1347_v41, %v482_v19  ;;  %v890_v23 = vadd.f32 %v1349_v42, %v531_v22 }
 0x101   :  { %v932_v24 = vpack.c.bf16 %v888_v20, %v887_v17 }
 0x102   :  { %v933_v25 = vpack.c.bf16 %v890_v23, %v889_v21 }
 0x103   :  { %964 = vst [vmem:[#allocation9 + $0x98] sm:$0xff] %v932_v24 }
 0x104   :  { %965 = vst [vmem:[#allocation9 + $0xa0] sm:$0xff] %v933_v25 }
 0x106   :  { %v580_v26 = vpop.f32.mrf.mxu2  ;;  %v629_v28 = vpop.f32.mrf.mxu3 }
 0x107   :  { %v891_v27 = vadd.f32 %v1353_v48, %v580_v26  ;;  %v484_v29 = vpop.f32.mrf.mxu0  ;;  %v892_v30 = vadd.f32 %v1355_v49, %v629_v28  ;;  %v533_v32 = vpop.f32.mrf.mxu1 }
 0x108   :  { %v893_v31 = vadd.f32 %v1347_v41, %v484_v29  ;;  %v894_v33 = vadd.f32 %v1349_v42, %v533_v32 }
 0x109   :  { %v934_v34 = vpack.c.bf16 %v892_v30, %v891_v27 }
 0x10a   :  { %v935_v35 = vpack.c.bf16 %v894_v33, %v893_v31 }
 0x10b   :  { %966 = vst [vmem:[#allocation9 + $0xa8] sm:$0xff] %v934_v34 }
 0x10c   :  { %967 = vst [vmem:[#allocation9 + $0xb0] sm:$0xff] %v935_v35 }
 0x10e   :  { %v582_v36 = vpop.f32.mrf.mxu2  ;;  %v631_v38 = vpop.f32.mrf.mxu3 }
 0x10f   :  { %v895_v37 = vadd.f32 %v1353_v48, %v582_v36  ;;  %v487_v39 = vpop.f32.mrf.mxu0  ;;  %v896_v40 = vadd.f32 %v1355_v49, %v631_v38  ;;  %v536_v44 = vpop.f32.mrf.mxu1 }
 0x110   :  { %v897_v43 = vadd.f32 %v1347_v41, %v487_v39  ;;  %v898_v45 = vadd.f32 %v1349_v42, %v536_v44 }
 0x111   :  { %v936_v46 = vpack.c.bf16 %v896_v40, %v895_v37 }
 0x112   :  { %v937_v47 = vpack.c.bf16 %v898_v45, %v897_v43 }
 0x113   :  { %968 = vst [vmem:[#allocation9 + $0xb8] sm:$0xff] %v936_v46 }
 0x114   :  { %969 = vst [vmem:[#allocation9 + $0xc0] sm:$0xff] %v937_v47 }
 0x116   :  { %v585_v50 = vpop.f32.mrf.mxu2  ;;  %v634_v52 = vpop.f32.mrf.mxu3 }
 0x117   :  { %v899_v51 = vadd.f32 %v1353_v48, %v585_v50  ;;  %v489_v53 = vpop.f32.mrf.mxu0  ;;  %v900_v54 = vadd.f32 %v1355_v49, %v634_v52  ;;  %v538_v56 = vpop.f32.mrf.mxu1 }
 0x118   :  { %v901_v55 = vadd.f32 %v1347_v41, %v489_v53  ;;  %v902_v57 = vadd.f32 %v1349_v42, %v538_v56 }
 0x119   :  { %v938_v58 = vpack.c.bf16 %v900_v54, %v899_v51 }
 0x11a   :  { %v939_v59 = vpack.c.bf16 %v902_v57, %v901_v55 }
 0x11b   :  { %970 = vst [vmem:[#allocation9 + $0xc8] sm:$0xff] %v938_v58 }
 0x11c   :  { %971 = vst [vmem:[#allocation9 + $0xd0] sm:$0xff] %v939_v59 }
 0x11e   :  { %v587_v60 = vpop.f32.mrf.mxu2  ;;  %v636_v62 = vpop.f32.mrf.mxu3 }
 0x11f   :  { %v903_v61 = vadd.f32 %v1353_v48, %v587_v60  ;;  %v492_v63 = vpop.f32.mrf.mxu0  ;;  %v904_v0 = vadd.f32 %v1355_v49, %v636_v62  ;;  %v541_v2 = vpop.f32.mrf.mxu1 }
 0x120   :  { %v905_v1 = vadd.f32 %v1347_v41, %v492_v63  ;;  %v906_v3 = vadd.f32 %v1349_v42, %v541_v2 }
 0x121   :  { %v940_v4 = vpack.c.bf16 %v904_v0, %v903_v61 }
 0x122   :  { %v941_v5 = vpack.c.bf16 %v906_v3, %v905_v1 }
 0x123   :  { %972 = vst [vmem:[#allocation9 + $0xd8] sm:$0xff] %v940_v4 }
 0x124   :  { %973 = vst [vmem:[#allocation9 + $0xe0] sm:$0xff] %v941_v5 }
 0x126   :  { %v590_v6 = vpop.f32.mrf.mxu2  ;;  %v639_v8 = vpop.f32.mrf.mxu3 }
 0x127   :  { %v907_v7 = vadd.f32 %v1353_v48, %v590_v6  ;;  %v494_v9 = vpop.f32.mrf.mxu0  ;;  %v908_v10 = vadd.f32 %v1355_v49, %v639_v8  ;;  %v543_v12 = vpop.f32.mrf.mxu1 }
 0x128   :  { %v909_v11 = vadd.f32 %v1347_v41, %v494_v9  ;;  %v910_v13 = vadd.f32 %v1349_v42, %v543_v12 }
 0x129   :  { %v942_v14 = vpack.c.bf16 %v908_v10, %v907_v7 }
 0x12a   :  { %v943_v15 = vpack.c.bf16 %v910_v13, %v909_v11 }
 0x12b   :  { %974 = vst [vmem:[#allocation9 + $0xe8] sm:$0xff] %v942_v14 }
 0x12c   :  { %975 = vst [vmem:[#allocation9 + $0xf0] sm:$0xff] %v943_v15 }
 0x12e   :  { %v592_v16 = vpop.f32.mrf.mxu2  ;;  %v641_v18 = vpop.f32.mrf.mxu3 }
 0x12f   :  { %v911_v17 = vadd.f32 %v1353_v48, %v592_v16  ;;  %v912_v19 = vadd.f32 %v1355_v49, %v641_v18 }
 0x131   :  { %v944_v41 = vpack.c.bf16 %v912_v19, %v911_v17 }
 0x133   :  { %976 = vst [vmem:[#allocation9 + $0xf8] sm:$0xff] %v944_v41 }
 0x134   :  { %989 = dma.vmem_to_hbm [thread:$0]  %s982_s29, 4096, %s984_s5, [#allocation5], %s1308_s20, %s1308_s20, %s1309_s21  }
 0x135   :  { %1305 = dma.done.wait [#allocation5], 4096  }
 0x136   :  { %1306 = vsyncadd [#allocation5], 4294963200 }
 0x137   :  { %994 = vsyncpa [#allocation4], 1 }
 0x138   :  { %995 = vsyncpa [#allocation7], 1 }
 0x139   :  { %996 = vsyncpa [#allocation5], 1 }

</bundles_post_ra>
